<compile_context>
chip_gen: v5e
topology: v5e:2x2
jax: 0.10.0
libtpu: 0.0.40
codegen_flags: <defaults>
</compile_context>

<pallas_src>
import functools

import jax
import jax.numpy as jnp
from jax.experimental import pallas as pl
from jax.experimental.pallas import tpu as pltpu

_MIB = 1024 * 1024


def _vmem_budget_bytes():
    """Usable VMEM budget for this kernel, per chip generation."""
    try:
        cap = int(pltpu.get_tpu_info().vmem_capacity_bytes)
    except Exception:  # query unavailable -> assume smallest (v7x-sized) VMEM
        cap = 64 * _MIB
    # Leave headroom for compiler-internal scratch: ~40 MiB usable on v7x
    # (64 MiB physical), ~96 MiB on v5e/v6e (128 MiB physical).
    return max(16 * _MIB, min(cap - 24 * _MIB, (3 * cap) // 4))


def _fused_conv_bn_relu_kernel(x_ref, w_ref, g_ref, b_ref, o_ref, *scratch,
                               m_true, eps, resident):
    if resident:
        y_res, sum_ref, sumsq_ref, scale_ref, shift_ref = scratch
    else:
        y_res = None
        sum_ref, sumsq_ref, scale_ref, shift_ref = scratch

    phase = pl.program_id(0)   # 0: GEMM + batch stats, 1: normalize + ReLU
    tile = pl.program_id(1)

    @pl.when(phase == 0)
    def _gemm_and_stats():
        @pl.when(tile == 0)
        def _init_stats():
            sum_ref[...] = jnp.zeros_like(sum_ref)
            sumsq_ref[...] = jnp.zeros_like(sumsq_ref)

        # [Cout, K] @ [K, tm] -> [Cout, tm]; bf16 MXU feed, f32 accumulation;
        # lane (last) dim is tm >= 128 -> unmasked lane-dense stores.
        # TODO(synk): for tiny Cout*K (e.g. 8x36 in the test) the MXU is mostly
        #   idle; a VPU broadcast-FMA contraction could bypass it, but jnp.dot
        #   is kept for real GoogLeNet layer sizes (Cout, K >= 128).
        y = jnp.dot(w_ref[...], x_ref[...], preferred_element_type=jnp.float32)

        # Zero-padded M columns contribute exactly 0 to both accumulators.
        sum_ref[...] += jnp.sum(y, axis=1, keepdims=True)
        sumsq_ref[...] += jnp.sum(y * y, axis=1, keepdims=True)

        if resident:
            y_res[tile] = y            # keep conv output resident in VMEM

        # Defensive defined write: the output block index is pinned to (0, 0)
        # during phase 0, so this never reaches HBM, but it guarantees o_ref is
        # never flushed uninitialized if writeback semantics ever change.
        o_ref[...] = y.astype(o_ref.dtype)

    @pl.when(phase == 1)
    def _normalize_relu():
        @pl.when(tile == 0)
        def _finalize_stats():
            inv_m = 1.0 / m_true
            mean = sum_ref[...] * inv_m
            # NOTE: E[y^2] - E[y]^2 in f32; fine for this forward pass, use a
            # shifted/Welford update if this ever feeds training gradients.
            var = sumsq_ref[...] * inv_m - mean * mean
            sc = g_ref[...] * jax.lax.rsqrt(var + eps)      # rsqrt -> EUP
            scale_ref[...] = sc
            shift_ref[...] = b_ref[...] - mean * sc

        if resident:
            y = y_res[tile]            # no second HBM read / MXU pass
        else:
            y = jnp.dot(w_ref[...], x_ref[...],
                        preferred_element_type=jnp.float32)
        o_ref[...] = jnp.maximum(y * scale_ref[...] + shift_ref[...],
                                 0.0).astype(o_ref.dtype)


def basic_conv2d(x, weight, gamma, beta, *, stride=1, padding=1, eps=0.01,
                 tm=1024):
    """x: [N, Cin, H, W] f32, weight: [Cout, Cin, KH, KW] f32 (PyTorch layout)."""
    N, Cin, H, W = x.shape
    Cout, _, KH, KW = weight.shape
    Hout = (H + 2 * padding - KH) // stride + 1
    Wout = (W + 2 * padding - KW) // stride + 1
    M = N * Hout * Wout
    K = Cin * KH * KW

    # ---- im2col glue (XLA): cast to bf16 FIRST, build directly in [K, M]
    #      (transposed) order so no separate f32 buffer / [M,K]->[K,M] pass. ----
    xp = jnp.pad(x.astype(jnp.bfloat16),
                 ((0, 0), (0, 0), (padding, padding), (padding, padding)))
    taps = []
    for kh in range(KH):
        for kw in range(KW):
            taps.append(xp[:, :, kh:kh + stride * Hout:stride,
                               kw:kw + stride * Wout:stride])
    # (KH*KW, N, Cin, Hout, Wout) -> (Cin, KH*KW, N, Hout, Wout) -> (K, M)
    xcol_t = jnp.transpose(jnp.stack(taps, axis=0),
                           (2, 0, 1, 3, 4)).reshape(K, M)
    # Weight flattened in the same (cin, kh, kw) K-order -> no transpose needed.
    wmat_t = weight.reshape(Cout, K).astype(jnp.bfloat16)          # [Cout, K]

    # ---- per-chip VMEM budget and tiling over M (lane axis). ----
    budget = _vmem_budget_bytes()

    def _stream_bytes(tm_, n_xbuf_):
        return (n_xbuf_ * K * tm_ * 2          # streamed Xcol^T tiles (bf16)
                + 2 * Cout * tm_ * 4           # output tiles (f32)
                + 2 * Cout * K * 2             # resident W (bf16)
                + 4 * Cout * 4                 # gamma/beta
                + 4 * Cout * 4)                # stats/scale/shift scratch

    tm = max(128, (int(tm) // 128) * 128)
    tm = min(tm, ((M + 127) // 128) * 128)     # don't over-pad tiny layers
    while tm > 128 and 3 * _stream_bytes(tm, 2) > 2 * budget:      # 1.5x margin
        tm = max(128, ((tm // 2) // 128) * 128)

    n_tiles = (M + tm - 1) // tm
    Mp = n_tiles * tm
    xcol_t = jnp.pad(xcol_t, ((0, 0), (0, Mp - M)))

    # Keep the full conv output resident in VMEM across the two phases when it
    # fits the per-generation budget (64 MiB physical on v7x vs 128 MiB on
    # v5e/v6e); otherwise fall back to recomputing the GEMM in phase 1.
    y_res_bytes = n_tiles * Cout * tm * 4
    resident = 3 * (_stream_bytes(tm, 2) + y_res_bytes) <= 2 * budget
    # 3-deep X buffering only pays when X is streamed over several tiles.
    n_xbuf = 3 if (n_tiles >= 2 and
                   3 * (_stream_bytes(tm, 3)
                        + (y_res_bytes if resident else 0)) <= 2 * budget) else 2

    vmem_limit = int(min(budget,
                         max(16 * _MIB,
                             (3 * (_stream_bytes(tm, n_xbuf)
                                   + (y_res_bytes if resident else 0))) // 2)))

    if resident:
        # Pin the X block during phase 1: the conv output is read back from the
        # VMEM scratch, so Xcol is pulled from HBM only once (+1 tile at the
        # phase transition).
        x_index_map = lambda p, i: (0, i * (1 - p))
    else:
        x_index_map = lambda p, i: (0, i)

    def _x_spec(index_map, n_buf):
        # Deeper input buffering (review item); guarded so older Pallas versions
        # without pipeline_mode / Buffered still work.
        if n_buf > 2 and hasattr(pl, "Buffered"):
            try:
                return pl.BlockSpec((K, tm), index_map,
                                    pipeline_mode=pl.Buffered(n_buf))
            except TypeError:
                pass
        return pl.BlockSpec((K, tm), index_map)

    gamma2 = gamma.reshape(Cout, 1).astype(jnp.float32)
    beta2 = beta.reshape(Cout, 1).astype(jnp.float32)

    kernel = functools.partial(_fused_conv_bn_relu_kernel,
                               m_true=float(M), eps=float(eps),
                               resident=resident)

    scratch_shapes = (
        ([pltpu.VMEM((n_tiles, Cout, tm), jnp.float32)] if resident else [])
        + [pltpu.VMEM((Cout, 1), jnp.float32)] * 4)

    gemm_passes = 1 if resident else 2
    cost = pl.CostEstimate(
        flops=gemm_passes * 2 * M * K * Cout + 4 * M * Cout,
        transcendentals=Cout,                       # one rsqrt per channel
        bytes_accessed=(gemm_passes * K * Mp * 2    # Xcol^T reads (bf16)
                        + Cout * K * 2              # W (bf16)
                        + Cout * Mp * 4             # output write (f32)
                        + 4 * Cout * 4))

    out = pl.pallas_call(
        kernel,
        out_shape=jax.ShapeDtypeStruct((Cout, Mp), jnp.float32),
        grid_spec=pltpu.PrefetchScalarGridSpec(
            num_scalar_prefetch=0,
            grid=(2, n_tiles),                                   # (phase, tile)
            in_specs=[
                _x_spec(x_index_map, n_xbuf),                    # Xcol^T tile
                pl.BlockSpec((Cout, K), lambda p, i: (0, 0)),    # W (resident)
                pl.BlockSpec((Cout, 1), lambda p, i: (0, 0)),    # gamma
                pl.BlockSpec((Cout, 1), lambda p, i: (0, 0)),    # beta
            ],
            # Output block index is pinned to (0, 0) for all of phase 0
            # (i * p == 0), so no HBM writeback happens until phase 1 overwrites
            # every tile with the final normalized + ReLU'd values.  The kernel
            # additionally writes a defined value into o_ref during phase 0, so
            # a future writeback-semantics change cannot flush garbage.
            out_specs=pl.BlockSpec((Cout, tm), lambda p, i: (0, i * p)),
            scratch_shapes=scratch_shapes),
        compiler_params=pltpu.CompilerParams(
            # Both axes must stay serial: phase 1 depends on phase 0's stats and
            # the stats accumulate into shared scratch.
            # TODO(synk): per-core partial sum/sumsq (or a leading core-sized
            #   grid axis) would let the tile axis be "parallel" and light up
            #   v7x's second TensorCore; skipped here (no win on v5e/v6e).
            dimension_semantics=("arbitrary", "arbitrary"),
            vmem_limit_bytes=vmem_limit),
        cost_estimate=cost,
    )(xcol_t, wmat_t, gamma2, beta2)

    out = out[:, :M].reshape(Cout, N, Hout, Wout)
    return jnp.transpose(out, (1, 0, 2, 3))                      # -> NCHW


def _reference(x, weight, gamma, beta, *, stride=1, padding=1, eps=0.01):
    """Pure-JAX f32 reference: conv -> training-mode BN -> ReLU."""
    y = jax.lax.conv_general_dilated(
        x, weight, window_strides=(stride, stride),
        padding=[(padding, padding), (padding, padding)],
        dimension_numbers=("NCHW", "OIHW", "NCHW"))
    mean = jnp.mean(y, axis=(0, 2, 3), keepdims=True)
    var = jnp.mean((y - mean) ** 2, axis=(0, 2, 3), keepdims=True)
    g = gamma.reshape(1, -1, 1, 1)
    b = beta.reshape(1, -1, 1, 1)
    yn = (y - mean) / jnp.sqrt(var + eps) * g + b
    return jnp.maximum(yn, 0.0)


if __name__ == "__main__":
    # BasicConv2d(in_channels=4, out_channels=8, kernel_size=3, padding=1)
    N, Cin, H, W = 2, 4, 16, 16
    Cout, KH, KW = 8, 3, 3

    key = jax.random.PRNGKey(0)
    kx, kw = jax.random.split(key)
    x = jax.random.normal(kx, (N, Cin, H, W), dtype=jnp.float32)
    weight = jax.random.normal(kw, (Cout, Cin, KH, KW), dtype=jnp.float32) * 0.1
    gamma = jnp.ones((Cout,), dtype=jnp.float32)    # BatchNorm2d default weight
    beta = jnp.zeros((Cout,), dtype=jnp.float32)    # BatchNorm2d default bias

    out = basic_conv2d(x, weight, gamma, beta, stride=1, padding=1, eps=0.01)
    out = jax.block_until_ready(out)

    ref = _reference(x, weight, gamma, beta, stride=1, padding=1, eps=0.01)
    assert out.shape == (N, Cout, H, W), out.shape
    # bf16 MXU inputs (f32 accumulation): compare against the f32 reference
    # with bf16-level tolerance.
    assert jnp.allclose(out, ref, rtol=2e-2, atol=2e-2), \
        float(jnp.max(jnp.abs(out - ref)))

    print("KERNEL_OK")
</pallas_src>

<mosaic_0001>
module attributes {stable_mosaic.version = 11 : i64} {
  func.func @_fused_conv_bn_relu_kernel(%arg0: i32, %arg1: i32, %arg2: memref<36x512xbf16, #tpu.memory_space<vmem>>, %arg3: memref<8x36xbf16, #tpu.memory_space<vmem>>, %arg4: memref<8x1xf32, #tpu.memory_space<vmem>>, %arg5: memref<8x1xf32, #tpu.memory_space<vmem>>, %arg6: memref<8x512xf32, #tpu.memory_space<vmem>>, %arg7: memref<1x8x512xf32, #tpu.memory_space<vmem>>, %arg8: memref<8x1xf32, #tpu.memory_space<vmem>>, %arg9: memref<8x1xf32, #tpu.memory_space<vmem>>, %arg10: memref<8x1xf32, #tpu.memory_space<vmem>>, %arg11: memref<8x1xf32, #tpu.memory_space<vmem>>) attributes {dimension_semantics = [#tpu.dimension_semantics<arbitrary>, #tpu.dimension_semantics<arbitrary>], iteration_bounds = array<i64: 2, 1>, scalar_prefetch = 0 : i64, scratch_operands = 5 : i64, tpu.core_type = #tpu.core_type<tc>, window_params = [{transform_indices = @transform_0, window_bounds = array<i64: 36, 512>}, {pipeline_mode = #tpu.pipeline_mode<synchronous>, transform_indices = @transform_1, window_bounds = array<i64: 8, 36>}, {pipeline_mode = #tpu.pipeline_mode<synchronous>, transform_indices = @transform_2, window_bounds = array<i64: 8, 1>}, {pipeline_mode = #tpu.pipeline_mode<synchronous>, transform_indices = @transform_3, window_bounds = array<i64: 8, 1>}, {transform_indices = @transform_4, window_bounds = array<i64: 8, 512>}]} {
    %c0_i32 = arith.constant 0 : i32
    %0 = arith.cmpi eq, %arg0, %c0_i32 : i32
    %1 = arith.extui %0 : i1 to i32
    %c0_i32_0 = arith.constant 0 : i32
    %2 = arith.cmpi ne, %1, %c0_i32_0 : i32
    scf.if %2 {
      %c0_i32_2 = arith.constant 0 : i32
      %6 = arith.cmpi eq, %arg1, %c0_i32_2 : i32
      %7 = arith.extui %6 : i1 to i32
      %c0_i32_3 = arith.constant 0 : i32
      %8 = arith.cmpi ne, %7, %c0_i32_3 : i32
      scf.if %8 {
        %cst_21 = arith.constant 0.000000e+00 : f32
        %28 = vector.broadcast %cst_21 : f32 to vector<8x1xf32>
        %c0_22 = arith.constant 0 : index
        %c0_23 = arith.constant 0 : index
        %29 = vector.load %arg8[%c0_22, %c0_23] : memref<8x1xf32, #tpu.memory_space<vmem>>, vector<8x1xf32>
        tpu.vector_store %arg8[%c0_22, %c0_23], %28 {strides = array<i32>} : memref<8x1xf32, #tpu.memory_space<vmem>>, vector<8x1xf32>,
        %cst_24 = arith.constant 0.000000e+00 : f32
        %30 = vector.broadcast %cst_24 : f32 to vector<8x1xf32>
        %c0_25 = arith.constant 0 : index
        %c0_26 = arith.constant 0 : index
        %31 = vector.load %arg9[%c0_25, %c0_26] : memref<8x1xf32, #tpu.memory_space<vmem>>, vector<8x1xf32>
        tpu.vector_store %arg9[%c0_25, %c0_26], %30 {strides = array<i32>} : memref<8x1xf32, #tpu.memory_space<vmem>>, vector<8x1xf32>,
      } else {
      }
      %c0 = arith.constant 0 : index
      %c0_4 = arith.constant 0 : index
      %9 = vector.load %arg3[%c0, %c0_4] : memref<8x36xbf16, #tpu.memory_space<vmem>>, vector<8x36xbf16>
      %c0_5 = arith.constant 0 : index
      %c0_6 = arith.constant 0 : index
      %10 = vector.load %arg2[%c0_5, %c0_6] : memref<36x512xbf16, #tpu.memory_space<vmem>>, vector<36x512xbf16>
      %cst = arith.constant dense<0.000000e+00> : vector<8x512xf32>
      %11 = tpu.matmul %9, %10, %cst {dimension_numbers = #tpu.dot_dimension_numbers<[1], [0], [0], [1], [0, 0, 1, 1], [], []>} : vector<8x36xbf16>, vector<36x512xbf16>, vector<8x512xf32> -> vector<8x512xf32>
      %c0_7 = arith.constant 0 : index
      %c0_8 = arith.constant 0 : index
      %12 = vector.load %arg8[%c0_7, %c0_8] : memref<8x1xf32, #tpu.memory_space<vmem>>, vector<8x1xf32>
      %cst_9 = arith.constant dense<0.000000e+00> : vector<8xf32>
      %13 = vector.multi_reduction <add>, %11, %cst_9 [1] : vector<8x512xf32> to vector<8xf32>
      %14 = vector.shape_cast %13 : vector<8xf32> to vector<8x1xf32>
      %15 = arith.addf %12, %14 : vector<8x1xf32>
      %c0_10 = arith.constant 0 : index
      %c0_11 = arith.constant 0 : index
      %16 = vector.load %arg8[%c0_10, %c0_11] : memref<8x1xf32, #tpu.memory_space<vmem>>, vector<8x1xf32>
      tpu.vector_store %arg8[%c0_10, %c0_11], %15 {strides = array<i32>} : memref<8x1xf32, #tpu.memory_space<vmem>>, vector<8x1xf32>,
      %c0_12 = arith.constant 0 : index
      %c0_13 = arith.constant 0 : index
      %17 = vector.load %arg9[%c0_12, %c0_13] : memref<8x1xf32, #tpu.memory_space<vmem>>, vector<8x1xf32>
      %18 = arith.mulf %11, %11 : vector<8x512xf32>
      %cst_14 = arith.constant dense<0.000000e+00> : vector<8xf32>
      %19 = vector.multi_reduction <add>, %18, %cst_14 [1] : vector<8x512xf32> to vector<8xf32>
      %20 = vector.shape_cast %19 : vector<8xf32> to vector<8x1xf32>
      %21 = arith.addf %17, %20 : vector<8x1xf32>
      %c0_15 = arith.constant 0 : index
      %c0_16 = arith.constant 0 : index
      %22 = vector.load %arg9[%c0_15, %c0_16] : memref<8x1xf32, #tpu.memory_space<vmem>>, vector<8x1xf32>
      tpu.vector_store %arg9[%c0_15, %c0_16], %21 {strides = array<i32>} : memref<8x1xf32, #tpu.memory_space<vmem>>, vector<8x1xf32>,
      %23 = arith.index_cast %arg1 : i32 to index
      %c0_17 = arith.constant 0 : index
      %c0_18 = arith.constant 0 : index
      %24 = vector.load %arg7[%23, %c0_17, %c0_18] : memref<1x8x512xf32, #tpu.memory_space<vmem>>, vector<1x8x512xf32>
      %25 = vector.shape_cast %24 : vector<1x8x512xf32> to vector<8x512xf32>
      %26 = vector.shape_cast %11 : vector<8x512xf32> to vector<1x8x512xf32>
      tpu.vector_store %arg7[%23, %c0_17, %c0_18], %26 {strides = array<i32>} : memref<1x8x512xf32, #tpu.memory_space<vmem>>, vector<1x8x512xf32>,
      %c0_19 = arith.constant 0 : index
      %c0_20 = arith.constant 0 : index
      %27 = vector.load %arg6[%c0_19, %c0_20] : memref<8x512xf32, #tpu.memory_space<vmem>>, vector<8x512xf32>
      tpu.vector_store %arg6[%c0_19, %c0_20], %11 {strides = array<i32>} : memref<8x512xf32, #tpu.memory_space<vmem>>, vector<8x512xf32>,
    } else {
    }
    %c1_i32 = arith.constant 1 : i32
    %3 = arith.cmpi eq, %arg0, %c1_i32 : i32
    %4 = arith.extui %3 : i1 to i32
    %c0_i32_1 = arith.constant 0 : i32
    %5 = arith.cmpi ne, %4, %c0_i32_1 : i32
    scf.if %5 {
      %c0_i32_2 = arith.constant 0 : i32
      %6 = arith.cmpi eq, %arg1, %c0_i32_2 : i32
      %7 = arith.extui %6 : i1 to i32
      %c0_i32_3 = arith.constant 0 : i32
      %8 = arith.cmpi ne, %7, %c0_i32_3 : i32
      scf.if %8 {
        %c0_11 = arith.constant 0 : index
        %c0_12 = arith.constant 0 : index
        %21 = vector.load %arg8[%c0_11, %c0_12] : memref<8x1xf32, #tpu.memory_space<vmem>>, vector<8x1xf32>
        %cst_13 = arith.constant 0.001953125 : f32
        %22 = vector.broadcast %cst_13 : f32 to vector<8x1xf32>
        %23 = arith.mulf %21, %22 : vector<8x1xf32>
        %c0_14 = arith.constant 0 : index
        %c0_15 = arith.constant 0 : index
        %24 = vector.load %arg9[%c0_14, %c0_15] : memref<8x1xf32, #tpu.memory_space<vmem>>, vector<8x1xf32>
        %cst_16 = arith.constant 0.001953125 : f32
        %25 = vector.broadcast %cst_16 : f32 to vector<8x1xf32>
        %26 = arith.mulf %24, %25 : vector<8x1xf32>
        %27 = arith.mulf %23, %23 : vector<8x1xf32>
        %28 = arith.subf %26, %27 : vector<8x1xf32>
        %c0_17 = arith.constant 0 : index
        %c0_18 = arith.constant 0 : index
        %29 = vector.load %arg4[%c0_17, %c0_18] : memref<8x1xf32, #tpu.memory_space<vmem>>, vector<8x1xf32>
        %cst_19 = arith.constant 0.00999999977 : f32
        %30 = vector.broadcast %cst_19 : f32 to vector<8x1xf32>
        %31 = arith.addf %28, %30 : vector<8x1xf32>
        %32 = math.rsqrt %31 : vector<8x1xf32>
        %33 = arith.mulf %29, %32 : vector<8x1xf32>
        %c0_20 = arith.constant 0 : index
        %c0_21 = arith.constant 0 : index
        %34 = vector.load %arg10[%c0_20, %c0_21] : memref<8x1xf32, #tpu.memory_space<vmem>>, vector<8x1xf32>
        tpu.vector_store %arg10[%c0_20, %c0_21], %33 {strides = array<i32>} : memref<8x1xf32, #tpu.memory_space<vmem>>, vector<8x1xf32>,
        %c0_22 = arith.constant 0 : index
        %c0_23 = arith.constant 0 : index
        %35 = vector.load %arg5[%c0_22, %c0_23] : memref<8x1xf32, #tpu.memory_space<vmem>>, vector<8x1xf32>
        %36 = arith.mulf %23, %33 : vector<8x1xf32>
        %37 = arith.subf %35, %36 : vector<8x1xf32>
        %c0_24 = arith.constant 0 : index
        %c0_25 = arith.constant 0 : index
        %38 = vector.load %arg11[%c0_24, %c0_25] : memref<8x1xf32, #tpu.memory_space<vmem>>, vector<8x1xf32>
        tpu.vector_store %arg11[%c0_24, %c0_25], %37 {strides = array<i32>} : memref<8x1xf32, #tpu.memory_space<vmem>>, vector<8x1xf32>,
      } else {
      }
      %9 = arith.index_cast %arg1 : i32 to index
      %c0 = arith.constant 0 : index
      %c0_4 = arith.constant 0 : index
      %10 = vector.load %arg7[%9, %c0, %c0_4] : memref<1x8x512xf32, #tpu.memory_space<vmem>>, vector<1x8x512xf32>
      %11 = vector.shape_cast %10 : vector<1x8x512xf32> to vector<8x512xf32>
      %c0_5 = arith.constant 0 : index
      %c0_6 = arith.constant 0 : index
      %12 = vector.load %arg10[%c0_5, %c0_6] : memref<8x1xf32, #tpu.memory_space<vmem>>, vector<8x1xf32>
      %13 = vector.broadcast %12 : vector<8x1xf32> to vector<8x512xf32>
      %14 = arith.mulf %11, %13 : vector<8x512xf32>
      %c0_7 = arith.constant 0 : index
      %c0_8 = arith.constant 0 : index
      %15 = vector.load %arg11[%c0_7, %c0_8] : memref<8x1xf32, #tpu.memory_space<vmem>>, vector<8x1xf32>
      %16 = vector.broadcast %15 : vector<8x1xf32> to vector<8x512xf32>
      %17 = arith.addf %14, %16 : vector<8x512xf32>
      %cst = arith.constant 0.000000e+00 : f32
      %18 = vector.broadcast %cst : f32 to vector<8x512xf32>
      %19 = arith.maximumf %17, %18 : vector<8x512xf32>
      %c0_9 = arith.constant 0 : index
      %c0_10 = arith.constant 0 : index
      %20 = vector.load %arg6[%c0_9, %c0_10] : memref<8x512xf32, #tpu.memory_space<vmem>>, vector<8x512xf32>
      tpu.vector_store %arg6[%c0_9, %c0_10], %19 {strides = array<i32>} : memref<8x512xf32, #tpu.memory_space<vmem>>, vector<8x512xf32>,
    } else {
    }
    return
  }
  func.func @transform_0(%arg0: i32, %arg1: i32) -> (i32, i32) {
    %c1_i32 = arith.constant 1 : i32
    %0 = arith.subi %c1_i32, %arg0 : i32
    %1 = arith.muli %arg1, %0 : i32
    %c0_i32 = arith.constant 0 : i32
    %c0_i32_0 = arith.constant 0 : i32
    return %c0_i32, %1 : i32, i32
  }
  func.func @transform_1(%arg0: i32, %arg1: i32) -> (i32, i32) {
    %c0_i32 = arith.constant 0 : i32
    %c0_i32_0 = arith.constant 0 : i32
    %c0_i32_1 = arith.constant 0 : i32
    return %c0_i32, %c0_i32_0 : i32, i32
  }
  func.func @transform_2(%arg0: i32, %arg1: i32) -> (i32, i32) {
    %c0_i32 = arith.constant 0 : i32
    %c0_i32_0 = arith.constant 0 : i32
    %c0_i32_1 = arith.constant 0 : i32
    return %c0_i32, %c0_i32_0 : i32, i32
  }
  func.func @transform_3(%arg0: i32, %arg1: i32) -> (i32, i32) {
    %c0_i32 = arith.constant 0 : i32
    %c0_i32_0 = arith.constant 0 : i32
    %c0_i32_1 = arith.constant 0 : i32
    return %c0_i32, %c0_i32_0 : i32, i32
  }
  func.func @transform_4(%arg0: i32, %arg1: i32) -> (i32, i32) {
    %0 = arith.muli %arg1, %arg0 : i32
    %c0_i32 = arith.constant 0 : i32
    %c0_i32_0 = arith.constant 0 : i32
    return %c0_i32, %0 : i32, i32
  }
}

</mosaic_0001>

<bundles_post_ra>
// kernel: tpu_custom_call.1
= control target key start
LH: loop header
LB: loop body
LE: loop exit
PB: predicated region body
PF: predicated region fallthrough
CT: control target
= control target key end

     0   :  { %9 = vsyncpa [#allocation8], 0  ;;  %s881_s0 = inlined_call_operand.hbm [shape: bf16[36,512], index: 0, kind: input, shape index: {}]   ;;  %s882_s1 = inlined_call_operand.vmem [shape: bf16[8,36], index: 1, kind: input, shape index: {}]   ;;  %s883_s2 = inlined_call_operand.vmem [shape: f32[8,1], index: 2, kind: input, shape index: {}]   ;;  %s884_s3 = inlined_call_operand.vmem [shape: f32[8,1], index: 3, kind: input, shape index: {}]   ;;  %s885_s4 = inlined_call_operand.hbm [shape: f32[8,512], index: 4, kind: output, shape index: {}]  }
   0x1   :  { %11 = vsyncpa [#allocation8 + $0x1], 0 }
   0x2   :  { %12 = vsyncpa [#allocation9], 0 }
   0x3   :  { %14 = vsyncpa [#allocation9 + $0x1], 0  ;;  %s818_s15 = smov 0   ;;  %s820_s16 = smov 0  }
   0x4   :  { %s822_s17 = smov 0  }
   0x5 LB: > { %s585_s18 = sadd.s32 4294967295, %s785_s17   ;;  %s586_s19 = sadd.s32 4294967294, %s785_s17   ;;  %s785_s17 = sphi %s822_s17, %s20_s17   ;;  %s781_s16 = sphi %s820_s16, %s887_s16   ;;  %s777_s15 = sphi %s818_s15, %s886_s15  }
   0x6   : > { %s32_s20 = sadd.s32 1, %s781_s16  ;;  %p588_p0 = scmp.ge.s32.totalorder %s785_s17, 2 }
   0x7   : > { %p34_p1 = scmp.ge.s32.totalorder %s32_s20, 2  ;;  %p658_p2 = scmp.lt.s32.totalorder %s785_s17, 2 }
   0x8   : > { %p659_p3 = scmp.eq.s32.totalorder %s785_s17, 0  ;;  %s192_s23 = sshll.u32 %s881_s0, 4  ;;  %s193_s23 = int_to_ptr.hbm [resolvable:$true] %s192_s23 }
   0x9   : > { %s889_s20 = smov (%p34_p1, %s32_s20), 0  ;;  %s787_s24 = smov [#allocation7]  }
   0xa   : > { %s194_s25 = sshll.u32 %s787_s24, 4  ;;  %p651_p4 = pnand %p659_p3, %p658_p2  ;;  %s195_s25 = int_to_ptr.vmem [resolvable:$true] %s194_s25 }
   0xb   : > { %p590_p5 = scmp.ge.s32.totalorder %s785_s17, 1  ;;  %s788_s26 = smov 256  }
   0xc   : > { %s789_s27 = smov 16   ;;  %p202_p6 = scmp.lt.s32.totalorder %s785_s17, 3 }
   0xd   : > { %653 = dma.hbm_to_vmem [thread:$0]  (!%p651_p4), %s193_s23, 1280, %s195_s25, [#allocation8], %s788_s26, %s788_s26, %s789_s27  }
   0xe   : > { %p203_p7 = pnand %p590_p5, %p202_p6 }
   0xf   : > { %p660_p8 = scmp.eq.s32.totalorder (!%p203_p7), %s585_s18, 0 }
  0x10   : > { %206 = sbr.rel (%p203_p7) target bundleno = 489 (0x1e9), region = 36 }
  0x15   : > { %768 = dma.done.wait (%p660_p8), [#allocation8], 1280  }
  0x16   : > { %770 = vsyncadd (%p660_p8), [#allocation8], 4294966016  ;;  %p592_p9 = scmp.ne.s32.totalorder %s777_s15, 0 }
  0x18   : > { %247 = sbr.rel (%p592_p9) target bundleno = 310 (0x136), region = 44 }
  0x1d   : > { %v264_v0 = vld [vmem:[#allocation7 + $0x40] sm:$0x33]  ;;  %v265_v1 = vld [vmem:[#allocation7 + $0x48] sm:$0x33]  ;;  %vm320_vm0 = vcmask 1041408   ;;  %vm316_vm1 = vcmask 293888  }
  0x1e   : > { %v292_v2 = vunpack.c.l.b16 %v264_v0  ;;  %v293_v3 = vunpack.c.h.b16 %v264_v0  ;;  %v294_v4 = vunpack.c.l.b16 %v265_v1  ;;  %v295_v5 = vunpack.c.h.b16 %v265_v1  ;;  %v611_v6 = vld [vmem:[#allocation7 + $0x20] sm:$0xf]  ;;  %v640_v7 = vld [vmem:[#allocation7 + $0x2c] sm:$0xf0]  ;;  %v638_v12 = vld [vmem:[#allocation7 + $0x24] sm:$0xf] }
  0x1f   : > { %v613_v13 = vld [vmem:[#allocation7 + $0x30] sm:$0xf0]  ;;  %v619_v14 = vld [vmem:[#allocation7 + $0x28] sm:$0xf]  ;;  %v641_v15 = vld [vmem:[#allocation7 + $0x34] sm:$0xf0]  ;;  %v612_v22 = vor.u32 %v640_v7, %v611_v6 }
  0x20   : > { %v304_v8 = vpack.c.b16 %v292_v2, %v292_v2  ;;  %v305_v9 = vpack.c.b16 %v293_v3, %v293_v3  ;;  %v306_v10 = vpack.c.b16 %v294_v4, %v294_v4  ;;  %v307_v11 = vpack.c.b16 %v295_v5, %v295_v5  ;;  %v639_v16 = vld [vmem:[#allocation7 + $0x2c] sm:$0xf]  ;;  %v621_v17 = vld [vmem:[#allocation7 + $0x38] sm:$0xf0]  ;;  %v595_v24 = vld [vmem:[#allocation7] sm:$0xf] }
  0x21   : > { %v616_v23 = vor.u32 %v638_v12, %v613_v13  ;;  %v636_v25 = vld [vmem:[#allocation7 + $0xc] sm:$0xf0]  ;;  %v620_v26 = vor.u32 %v641_v15, %v619_v14  ;;  %v624_v27 = vor.u32 %v639_v16, %v621_v17  ;;  %v634_v28 = vld [vmem:[#allocation7 + $0x4] sm:$0xf]  ;;  %v597_v29 = vld [vmem:[#allocation7 + $0x10] sm:$0xf0] }
  0x22   : > { %v322_v18 = vsel %vm320_vm0, %v304_v8, 0  ;;  %v325_v19 = vsel %vm320_vm0, %v305_v9, 0  ;;  %v328_v20 = vsel %vm320_vm0, %v306_v10, 0  ;;  %v331_v21 = vsel %vm320_vm0, %v307_v11, 0  ;;  %v603_v30 = vld [vmem:[#allocation7 + $0x8] sm:$0xf] }
  0x23   : > { %338 = vmatpush.bf16.msra.mxu0 %v322_v18  ;;  %351 = vmatpush.bf16.msra.mxu1 %v325_v19  ;;  %v637_v31 = vld [vmem:[#allocation7 + $0x14] sm:$0xf0]  ;;  %v635_v32 = vld [vmem:[#allocation7 + $0xc] sm:$0xf]  ;;  %v605_v33 = vld [vmem:[#allocation7 + $0x18] sm:$0xf0]  ;;  %v596_v34 = vor.u32 %v636_v25, %v595_v24  ;;  %v600_v35 = vor.u32 %v634_v28, %v597_v29 }
  0x24   : > { %364 = vmatpush.bf16.msra.mxu2 %v328_v20  ;;  %377 = vmatpush.bf16.msra.mxu3 %v331_v21  ;;  %v604_v36 = vor.u32 %v637_v31, %v603_v30  ;;  %v608_v37 = vor.u32 %v635_v32, %v605_v33  ;;  %v255_v38 = vld [vmem:[%s882_s1] sm:$0xf]  ;;  %vm252_vm2 = vcmask 7168   ;;  %v790_v57 = vmov 0.0  }
  0x25   : > { %253 = vst.msk [vmem:[#allocation3] sm:$0xff] %vm252_vm2, %v790_v57 }
  0x26   : > { %254 = vst.msk [vmem:[#allocation4] sm:$0xff] %vm252_vm2, %v790_v57 }
  0x27   : > { %339 = vmatpush.bf16.msra.mxu0 %v612_v22  ;;  %352 = vmatpush.bf16.msra.mxu1 %v616_v23 }
  0x28   : > { %365 = vmatpush.bf16.msra.mxu2 %v620_v26  ;;  %378 = vmatpush.bf16.msra.mxu3 %v624_v27 }
  0x2b   : > { %340 = vmatpush.bf16.msra.mxu0 %v596_v34  ;;  %353 = vmatpush.bf16.msra.mxu1 %v600_v35 }
  0x2c   : > { %366 = vmatpush.bf16.msra.mxu2 %v604_v36  ;;  %379 = vmatpush.bf16.msra.mxu3 %v608_v37  ;;  %v385_v58 = vld [vmem:[#allocation3] sm:$0xff] }
  0x2d   : > { %v394_v61 = vld [vmem:[#allocation4] sm:$0xff] }
  0x2e   : > { %625 = vmatmul.msk.bf16.vlgmr.msra.gmra.mxu0 %vm316_vm1, %v255_v38  ;;  %626 = vmatmul.msk.bf16.vlgmr.msra.gmra.mxu1 %vm316_vm1, %v255_v38 }
  0x2f   : > { %627 = vmatmul.msk.bf16.vlgmr.msra.gmra.mxu2 %vm316_vm1, %v255_v38  ;;  %628 = vmatmul.msk.bf16.vlgmr.msra.gmra.mxu3 %vm316_vm1, %v255_v38 }
  0xab   : > { %v342_v39 = vpop.f32.mrf.mxu0  ;;  %v355_v40 = vpop.f32.mrf.mxu1 }
  0xac   : > { %409 = vst [vmem:[#allocation2 + $0x10] sm:$0xff] %v342_v39  ;;  %v386_v41 = vadd.f32 %v355_v40, %v342_v39  ;;  %v395_v42 = vmul.f32 %v342_v39, %v342_v39  ;;  %v396_v43 = vmul.f32 %v355_v40, %v355_v40 }
  0xad   : > { %413 = vst [vmem:[#allocation10] sm:$0xff] %v342_v39 }
  0xae   : > { %410 = vst [vmem:[#allocation2] sm:$0xff] %v355_v40  ;;  %v399_v51 = vadd.f32 %v396_v43, %v395_v42 }
  0xaf   : > { %414 = vst [vmem:[#allocation10 + $0x8] sm:$0xff] %v355_v40 }
  0xb2   : > { %v368_v44 = vpop.f32.mrf.mxu2  ;;  %v381_v45 = vpop.f32.mrf.mxu3 }
  0xb3   : > { %411 = vst [vmem:[#allocation2 + $0x18] sm:$0xff] %v368_v44  ;;  %v344_v46 = vpop.f32.mrf.mxu0  ;;  %v357_v47 = vpop.f32.mrf.mxu1  ;;  %v387_v48 = vadd.f32 %v386_v41, %v368_v44  ;;  %v397_v50 = vmul.f32 %v368_v44, %v368_v44  ;;  %v398_v52 = vmul.f32 %v381_v45, %v381_v45 }
  0xb4   : > { %415 = vst [vmem:[#allocation10 + $0x10] sm:$0xff] %v368_v44 }
  0xb5   : > { %412 = vst [vmem:[#allocation2 + $0x8] sm:$0xff] %v381_v45  ;;  %v388_v49 = vadd.f32 %v387_v48, %v381_v45  ;;  %v400_v53 = vadd.f32 %v399_v51, %v397_v50 }
  0xb6   : > { %416 = vst [vmem:[#allocation10 + $0x18] sm:$0xff] %v381_v45 }
  0xb7   : > { %389 = vadd.xlane.f32.xlu0 %v388_v49  ;;  %v401_v56 = vadd.f32 %v400_v53, %v398_v52 }
  0xba   : > { %v370_v54 = vpop.f32.mrf.mxu2  ;;  %v383_v55 = vpop.f32.mrf.mxu3 }
  0xbf   : > { %402 = vadd.xlane.f32.xlu0 %v401_v56 }
 0x12a   : > { %v390_v59 = vpop.xlane.xlu0 %389 }
 0x12b   : > { %v391_v60 = vadd.f32 %v390_v59, %v385_v58 }
 0x12d   : > { %393 = vst.msk [vmem:[#allocation3] sm:$0xff] %vm252_vm2, %v391_v60 }
 0x132   : > { %v403_v62 = vpop.xlane.xlu0 %402 }
 0x133   : > { %v404_v63 = vadd.f32 %v403_v62, %v394_v61 }
 0x135   : > { %405 = vst.msk [vmem:[#allocation4] sm:$0xff] %vm252_vm2, %v404_v63 }
 0x136 PF: > { %p629_p10 = scmp.ne.s32.totalorder %s777_s15, 1 }
 0x138   : > { %420 = sbr.rel (%p629_p10) target bundleno = 485 (0x1e5), region = 52 }
 0x13d   : > { %v425_v0 = vld [vmem:[#allocation3] sm:$0xff]  ;;  %v427_v1 = vld [vmem:[#allocation4] sm:$0xff]  ;;  %v791_v2 = vmov 0   ;;  %vm444_vm6 = vcmask 7168   ;;  %v453_v23 = vld [vmem:[#allocation2 + $0x10] sm:$0xff] }
 0x13e   : > { %694 = vset.pattern.permute.xlu0 %v791_v2  ;;  %v426_v3 = vmul.f32 0.001953125, %v425_v0  ;;  %v428_v4 = vmul.f32 0.001953125, %v427_v1  ;;  %v431_v13 = vld [vmem:[%s883_s2] sm:$0xff]  ;;  %v455_v25 = vld [vmem:[#allocation2 + $0x18] sm:$0xff]  ;;  %v456_v26 = vld [vmem:[#allocation2 + $0x8] sm:$0xff] }
 0x13f   : > { %v446_v17 = vld [vmem:[%s884_s3] sm:$0xff] }
 0x140   : > { %v429_v5 = vmul.f32 %v426_v3, %v426_v3  ;;  %v454_v24 = vld [vmem:[#allocation2] sm:$0xff] }
 0x142   : > { %v430_v6 = vsub.f32 %v428_v4, %v429_v5 }
 0x144   : > { %v432_v7 = vadd.f32 0.01, %v430_v6 }
 0x146   : > { %695 = vrsqrt.f32 %v432_v7  ;;  %vm439_vm3 = vweird.f32 %v432_v7 }
 0x14c   : > { %v696_v8 = vpop.eup %695 }
 0x14d   : > { %v434_v9 = vmul.f32 %v696_v8, %v432_v7  ;;  %vm440_vm4 = vweird.f32 %v696_v8 }
 0x14e   : > { %vm441_vm5 = vmor %vm439_vm3, %vm440_vm4 }
 0x14f   : > { %v435_v10 = vmul.f32 %v696_v8, %v434_v9 }
 0x151   : > { %v436_v11 = vmul.f32 0.5, %v435_v10 }
 0x153   : > { %v437_v12 = vsub.f32 1.5, %v436_v11 }
 0x155   : > { %v438_v14 = vmul.f32 %v696_v8, %v437_v12 }
 0x157   : > { %v442_v15 = vsel %vm441_vm5, %v696_v8, %v438_v14 }
 0x158   : > { %v443_v16 = vmul.f32 %v442_v15, %v431_v13 }
 0x15a   : > { %445 = vst.msk [vmem:[#allocation5] sm:$0xff] %vm444_vm6, %v443_v16  ;;  %v447_v18 = vmul.f32 %v443_v16, %v426_v3 }
 0x15c   : > { %v448_v19 = vsub.f32 %v446_v17, %v447_v18 }
 0x15e   : > { %449 = vst.msk [vmem:[#allocation6] sm:$0xff] %vm444_vm6, %v448_v19 }
 0x161   : > { %v457_v20 = vld [vmem:[#allocation5] sm:$0xff] }
 0x162   : > { %460 = vperm.xlu0 %694, %v457_v20  }
 0x165   : > { %v467_v21 = vld [vmem:[#allocation6] sm:$0xff] }
 0x16a   : > { %470 = vperm.xlu0 %694, %v467_v21  }
 0x1d4   : > { %v461_v22 = vpop.permute.xlu0 %460 }
 0x1d5   : > { %v463_v27 = vmul.f32 %v461_v22, %v453_v23  ;;  %v464_v28 = vmul.f32 %v461_v22, %v454_v24  ;;  %v465_v29 = vmul.f32 %v461_v22, %v455_v25  ;;  %v466_v30 = vmul.f32 %v461_v22, %v456_v26 }
 0x1dc   : > { %v471_v31 = vpop.permute.xlu0 %470 }
 0x1dd   : > { %v473_v32 = vadd.f32 %v471_v31, %v463_v27  ;;  %v474_v33 = vadd.f32 %v471_v31, %v464_v28  ;;  %v475_v34 = vadd.f32 %v471_v31, %v465_v29  ;;  %v476_v35 = vadd.f32 %v471_v31, %v466_v30 }
 0x1df   : > { %v477_v36 = vmax.f32 %v473_v32, 0.0  ;;  %v478_v37 = vmax.f32 %v474_v33, 0.0  ;;  %v479_v38 = vmax.f32 %v475_v34, 0.0  ;;  %v480_v39 = vmax.f32 %v476_v35, 0.0 }
 0x1e1   : > { %481 = vst [vmem:[#allocation10] sm:$0xff] %v477_v36 }
 0x1e2   : > { %482 = vst [vmem:[#allocation10 + $0x8] sm:$0xff] %v478_v37 }
 0x1e3   : > { %483 = vst [vmem:[#allocation10 + $0x10] sm:$0xff] %v479_v38 }
 0x1e4   : > { %484 = vst [vmem:[#allocation10 + $0x18] sm:$0xff] %v480_v39 }
 0x1e5 PF: > { %p661_p11 = scmp.eq.s32.totalorder %s585_s18, 1  ;;  %s502_s10 = sshll.u32 %s885_s4, 4  ;;  %s503_s10 = int_to_ptr.hbm [resolvable:$true] %s502_s10 }
 0x1e6   : > { %s792_s11 = smov [#allocation10]  }
 0x1e7   : > { %s500_s12 = sshll.u32 %s792_s11, 4  ;;  %s501_s12 = int_to_ptr.vmem [resolvable:$true] %s500_s12 }
 0x1e8   : > { %647 = dma.vmem_to_hbm [thread:$0]  (%p661_p11), %s501_s12, 512, %s503_s10, [#allocation9]  }
 0x1e9 PF: > { %p663_p12 = scmp.eq.s32.totalorder %s586_s19, 1 }
 0x1eb   : > { %p655_p13 = pnand %p663_p12, %p588_p0 }
 0x1ed   : > { %p656_p1 = pneg %p655_p13 }
 0x1ef   : > { %772 = dma.done.wait (%p656_p1), [#allocation9], 512  }
 0x1f0   : > { %774 = vsyncadd (%p656_p1), [#allocation9], 4294966784  ;;  %s20_s17 = sadd.s32 1, %s785_s17   ;;  %s886_s15 = smov %s781_s16 }
 0x1f1   : > { %p17_p2 = scmp.ge.s32.totalorder %s20_s17, 4   ;;  %s887_s16 = smov %s889_s20 }
 0x1f3   :  { %19 = sbr.rel (!%p17_p2) target bundleno = 5 (0x5), region = 99 }
 0x1f8   :  { %521 = vsyncpa [#allocation8], 1 }
 0x1f9   :  { %523 = vsyncpa [#allocation8 + $0x1], 1 }
 0x1fa   :  { %524 = vsyncpa [#allocation9], 1 }
 0x1fb   :  { %526 = vsyncpa [#allocation9 + $0x1], 1 }

</bundles_post_ra>
